<compile_context>
chip_gen: v5e
topology: v5e:2x2
jax: 0.10.0
libtpu: 0.0.40
codegen_flags: <defaults>
</compile_context>

<pallas_src>
import functools
import math

import jax
import jax.numpy as jnp
from jax.experimental import pallas as pl
from jax.experimental.pallas import tpu as pltpu

TOK_BLOCK = 128   # tokens processed per grid step
LANE = 128        # TPU lane width


def _round_up(x, m):
    return ((x + m - 1) // m) * m


def _token_embedding_kernel(tok_ref, emb_ref, out_ref, *, scale, vocab_pad):
    # tok_ref: VMEM (TOK_BLOCK, 1) int32        -- token ids for this block
    # emb_ref: VMEM (vocab_pad, emb_pad) f32    -- embedding table (resident)
    # out_ref: VMEM (TOK_BLOCK, emb_pad) f32    -- gathered + scaled embeddings
    ids = tok_ref[...]                                             # (TOK_BLOCK, 1)
    iota = jax.lax.broadcasted_iota(jnp.int32, (TOK_BLOCK, vocab_pad), 1)
    one_hot = (iota == ids).astype(jnp.float32)                    # (TOK_BLOCK, vocab_pad)
    # One-hot MXU gather: each output row is exactly one table row (exact in f32).
    gathered = jnp.dot(one_hot, emb_ref[...],
                       preferred_element_type=jnp.float32)
    out_ref[...] = gathered * scale


def token_embedding(tokens, emb_table, emb_size):
    """tokens: (seq_len, batch) int, emb_table: (vocab, emb_size) f32."""
    seq_len, batch = tokens.shape
    vocab, emb = emb_table.shape
    assert emb == emb_size

    # Pad table to lane-aligned shape (lane-dense output is the big store lever).
    vocab_pad = _round_up(vocab, LANE)
    emb_pad = _round_up(emb, LANE)

    table_bytes = vocab_pad * emb_pad * 4
    # TODO(synk): for large vocab (table >~ 16 MiB) switch to an HBM-resident
    # table (memory_space=pl.ANY) with scalar-prefetched per-row DMA gather;
    # the VMEM-resident one-hot MXU path below is only for small vocabularies.
    assert table_bytes <= 16 * 1024 * 1024, "vocab too large for VMEM-resident path"

    table_p = jnp.pad(emb_table.astype(jnp.float32),
                      ((0, vocab_pad - vocab), (0, emb_pad - emb)))

    # Flatten + clamp + pad token ids; feed as an (n_pad, 1) column so the ids
    # sit on sublanes inside the kernel (matches the one-hot layout).
    flat = tokens.reshape(-1).astype(jnp.int32)
    n = flat.shape[0]
    n_pad = _round_up(max(n, 1), TOK_BLOCK)
    flat = jnp.clip(flat, 0, vocab - 1)          # guard against OOB ids
    flat = jnp.pad(flat, (0, n_pad - n)).reshape(n_pad, 1)

    scale = float(math.sqrt(emb_size))
    kernel = functools.partial(_token_embedding_kernel, scale=scale,
                               vocab_pad=vocab_pad)

    out_flat = pl.pallas_call(
        kernel,
        out_shape=jax.ShapeDtypeStruct((n_pad, emb_pad), jnp.float32),
        grid=(n_pad // TOK_BLOCK,),
        in_specs=[
            # token-id column for this block
            pl.BlockSpec((TOK_BLOCK, 1), lambda i: (i, 0)),
            # full (padded) embedding table, resident across the grid
            pl.BlockSpec((vocab_pad, emb_pad), lambda i: (0, 0)),
        ],
        out_specs=pl.BlockSpec((TOK_BLOCK, emb_pad), lambda i: (i, 0)),
        compiler_params=pltpu.CompilerParams(
            dimension_semantics=("parallel",),      # independent blocks -> megacore
            vmem_limit_bytes=64 * 1024 * 1024,
        ),
    )(flat, table_p)

    return out_flat[:n, :emb].reshape(seq_len, batch, emb_size)


if __name__ == "__main__":
    vocab_size = 64
    emb_size = 32
    seq_len = 8
    batch = 2

    key = jax.random.PRNGKey(0)
    k_emb, k_tok = jax.random.split(key)

    # nn.Embedding default init: weight ~ N(0, 1)
    emb_table = jax.random.normal(k_emb, (vocab_size, emb_size), dtype=jnp.float32)
    tokens = jax.random.randint(k_tok, (seq_len, batch), 0, vocab_size,
                                dtype=jnp.int32)

    out = token_embedding(tokens, emb_table, emb_size)
    out = jax.block_until_ready(out)

    # reference check (plain JAX)
    ref = jnp.take(emb_table, tokens.reshape(-1), axis=0).reshape(
        seq_len, batch, emb_size) * math.sqrt(emb_size)
    assert out.shape == (seq_len, batch, emb_size)
    assert jnp.allclose(out, ref, atol=1e-5, rtol=1e-5)

    print("KERNEL_OK")
</pallas_src>

<mosaic_0001>
module attributes {stable_mosaic.version = 11 : i64} {
  func.func @_token_embedding_kernel(%arg0: i32, %arg1: memref<128x1xi32, #tpu.memory_space<vmem>>, %arg2: memref<128x128xf32, #tpu.memory_space<vmem>>, %arg3: memref<128x128xf32, #tpu.memory_space<vmem>>) attributes {dimension_semantics = [#tpu.dimension_semantics<parallel>], iteration_bounds = array<i64: 1>, scalar_prefetch = 0 : i64, scratch_operands = 0 : i64, tpu.core_type = #tpu.core_type<tc>, window_params = [{transform_indices = @transform_0, window_bounds = array<i64: 128, 1>}, {pipeline_mode = #tpu.pipeline_mode<synchronous>, transform_indices = @transform_1, window_bounds = array<i64: 128, 128>}, {transform_indices = @transform_2, window_bounds = array<i64: 128, 128>}]} {
    %c0 = arith.constant 0 : index
    %c0_0 = arith.constant 0 : index
    %0 = vector.load %arg1[%c0, %c0_0] : memref<128x1xi32, #tpu.memory_space<vmem>>, vector<128x1xi32>
    %1 = tpu.iota {dimensions = array<i32: 1>} : vector<128x128xi32>
    %2 = vector.broadcast %0 : vector<128x1xi32> to vector<128x128xi32>
    %3 = arith.cmpi eq, %1, %2 : vector<128x128xi32>
    %4 = arith.extui %3 : vector<128x128xi1> to vector<128x128xi32>
    %5 = arith.sitofp %4 : vector<128x128xi32> to vector<128x128xf32>
    %c0_1 = arith.constant 0 : index
    %c0_2 = arith.constant 0 : index
    %6 = vector.load %arg2[%c0_1, %c0_2] : memref<128x128xf32, #tpu.memory_space<vmem>>, vector<128x128xf32>
    %cst = arith.constant dense<0.000000e+00> : vector<128x128xf32>
    %7 = tpu.matmul %5, %6, %cst {dimension_numbers = #tpu.dot_dimension_numbers<[1], [0], [0], [1], [0, 0, 1, 1], [], []>} : vector<128x128xf32>, vector<128x128xf32>, vector<128x128xf32> -> vector<128x128xf32>
    %cst_3 = arith.constant 5.65685415 : f32
    %8 = vector.broadcast %cst_3 : f32 to vector<128x128xf32>
    %9 = arith.mulf %7, %8 : vector<128x128xf32>
    %c0_4 = arith.constant 0 : index
    %c0_5 = arith.constant 0 : index
    %10 = vector.load %arg3[%c0_4, %c0_5] : memref<128x128xf32, #tpu.memory_space<vmem>>, vector<128x128xf32>
    tpu.vector_store %arg3[%c0_4, %c0_5], %9 {strides = array<i32>} : memref<128x128xf32, #tpu.memory_space<vmem>>, vector<128x128xf32>,
    return
  }
  func.func @transform_0(%arg0: i32) -> (i32, i32) {
    %c0_i32 = arith.constant 0 : i32
    %c0_i32_0 = arith.constant 0 : i32
    return %arg0, %c0_i32 : i32, i32
  }
  func.func @transform_1(%arg0: i32) -> (i32, i32) {
    %c0_i32 = arith.constant 0 : i32
    %c0_i32_0 = arith.constant 0 : i32
    %c0_i32_1 = arith.constant 0 : i32
    return %c0_i32, %c0_i32_0 : i32, i32
  }
  func.func @transform_2(%arg0: i32) -> (i32, i32) {
    %c0_i32 = arith.constant 0 : i32
    %c0_i32_0 = arith.constant 0 : i32
    return %arg0, %c0_i32 : i32, i32
  }
}

</mosaic_0001>

<bundles_post_ra>
// kernel: tpu_custom_call.1
= control target key start
LH: loop header
LB: loop body
LE: loop exit
PB: predicated region body
PF: predicated region fallthrough
CT: control target
= control target key end

     0   :  { %v371_v3 = vmov 0   ;;  %s490_s0 = inlined_call_operand.vmem [shape: s32[128,1], index: 0, kind: input, shape index: {}]   ;;  %s491_s1 = inlined_call_operand.vmem [shape: f32[128,128], index: 1, kind: input, shape index: {}]   ;;  %s492_s2 = inlined_call_operand.hbm [shape: f32[128,128], index: 2, kind: output, shape index: {}]  }
   0x1   :  { %v21_v0 = vld [vmem:[%s490_s0 + $0x48] sm:$0xff]  ;;  %v20_v1 = vld [vmem:[%s490_s0 + $0x40] sm:$0xff]  ;;  %344 = vset.pattern.permute.xlu2 %v371_v3  ;;  %343 = vset.pattern.permute.xlu1 %v371_v3 }
   0x2   :  { %v12_v2 = vld [vmem:[%s490_s0] sm:$0xff]  ;;  %342 = vset.pattern.permute.xlu0 %v371_v3  ;;  %58 = vperm.xlu2 %344, %v21_v0  }
   0x3   :  { %55 = vperm.xlu0 %342, %v20_v1   ;;  %31 = vperm.xlu1 %343, %v12_v2  }
   0x4   :  { %7 = vsyncpa [#allocation3], 0  ;;  %v25_v4 = vld [vmem:[%s490_s0 + $0x68] sm:$0xff]  ;;  %v24_v5 = vld [vmem:[%s490_s0 + $0x60] sm:$0xff]  ;;  %v28_v34 = vlaneseq  ;;  %v372_v39 = vmov 1.0   ;;  %s245_s19 = sshll.u32 %s492_s2, 4  ;;  %s246_s19 = int_to_ptr.hbm [resolvable:$true] %s245_s19 }
   0x5   :  { %v16_v6 = vld [vmem:[%s490_s0 + $0x20] sm:$0xff]  ;;  %v141_v7 = vld [vmem:[%s491_s1 + $0x78] sm:$0xff]  ;;  %v140_v8 = vld [vmem:[%s491_s1 + $0x70] sm:$0xff]  ;;  %s374_s20 = smov 128   ;;  %s375_s21 = smov 8  }
   0x6   :  { %290 = vmatpush.msra.mxu2 %v141_v7  ;;  %142 = vmatpush.msra.mxu0 %v141_v7  ;;  %v139_v9 = vld [vmem:[%s491_s1 + $0x68] sm:$0xff]  ;;  %v22_v10 = vld [vmem:[%s490_s0 + $0x50] sm:$0xff]  ;;  %v15_v16 = vld [vmem:[%s490_s0 + $0x18] sm:$0xff]  ;;  %v29_v35 = vand.u32 127, %v28_v34 }
   0x7   :  { %289 = vmatpush.msra.mxu1 %v141_v7  ;;  %291 = vmatpush.msra.mxu3 %v141_v7  ;;  %v13_v11 = vld [vmem:[%s490_s0 + $0x8] sm:$0xff]  ;;  %v18_v13 = vld [vmem:[%s490_s0 + $0x30] sm:$0xff]  ;;  %v23_v17 = vld [vmem:[%s490_s0 + $0x58] sm:$0xff] }
   0x8   :  { %293 = vmatpush.msra.mxu2 %v140_v8  ;;  %143 = vmatpush.msra.mxu0 %v140_v8  ;;  %v17_v12 = vld [vmem:[%s490_s0 + $0x28] sm:$0xff]  ;;  %v26_v14 = vld [vmem:[%s490_s0 + $0x70] sm:$0xff]  ;;  %v27_v18 = vld [vmem:[%s490_s0 + $0x78] sm:$0xff] }
   0x9   :  { %292 = vmatpush.msra.mxu1 %v140_v8  ;;  %294 = vmatpush.msra.mxu3 %v140_v8  ;;  %v14_v15 = vld [vmem:[%s490_s0 + $0x10] sm:$0xff]  ;;  %v19_v19 = vld [vmem:[%s490_s0 + $0x38] sm:$0xff]  ;;  %v138_v20 = vld [vmem:[%s491_s1 + $0x60] sm:$0xff] }
   0xa   :  { %70 = vperm.xlu2 %344, %v25_v4   ;;  %296 = vmatpush.msra.mxu2 %v139_v9  ;;  %v137_v21 = vld [vmem:[%s491_s1 + $0x58] sm:$0xff]  ;;  %v136_v22 = vld [vmem:[%s491_s1 + $0x50] sm:$0xff]  ;;  %v135_v23 = vld [vmem:[%s491_s1 + $0x48] sm:$0xff] }
   0xb   :  { %67 = vperm.xlu0 %342, %v24_v5   ;;  %43 = vperm.xlu1 %343, %v16_v6   ;;  %v134_v24 = vld [vmem:[%s491_s1 + $0x40] sm:$0xff]  ;;  %v133_v25 = vld [vmem:[%s491_s1 + $0x38] sm:$0xff]  ;;  %v132_v26 = vld [vmem:[%s491_s1 + $0x30] sm:$0xff] }
   0xc   :  { %144 = vmatpush.msra.mxu0 %v139_v9  ;;  %295 = vmatpush.msra.mxu1 %v139_v9  ;;  %v131_v27 = vld [vmem:[%s491_s1 + $0x28] sm:$0xff]  ;;  %v130_v28 = vld [vmem:[%s491_s1 + $0x20] sm:$0xff]  ;;  %v129_v29 = vld [vmem:[%s491_s1 + $0x18] sm:$0xff] }
   0xd   :  { %297 = vmatpush.msra.mxu3 %v139_v9  ;;  %299 = vmatpush.msra.mxu2 %v138_v20  ;;  %v128_v30 = vld [vmem:[%s491_s1 + $0x10] sm:$0xff]  ;;  %v127_v31 = vld [vmem:[%s491_s1 + $0x8] sm:$0xff]  ;;  %v126_v32 = vld [vmem:[%s491_s1] sm:$0xff]  ;;  %s373_s1 = smov [#allocation2]  }
   0xe   :  { %145 = vmatpush.msra.mxu0 %v138_v20  ;;  %298 = vmatpush.msra.mxu1 %v138_v20  ;;  %s243_s16 = sshll.u32 %s373_s1, 4  ;;  %s244_s16 = int_to_ptr.vmem [resolvable:$true] %s243_s16 }
   0xf   :  { %300 = vmatpush.msra.mxu3 %v138_v20  ;;  %302 = vmatpush.msra.mxu2 %v137_v21 }
  0x10   :  { %146 = vmatpush.msra.mxu0 %v137_v21  ;;  %301 = vmatpush.msra.mxu1 %v137_v21 }
  0x11   :  { %303 = vmatpush.msra.mxu3 %v137_v21  ;;  %305 = vmatpush.msra.mxu2 %v136_v22 }
  0x12   :  { %61 = vperm.xlu2 %344, %v22_v10   ;;  %147 = vmatpush.msra.mxu0 %v136_v22 }
  0x13   :  { %34 = vperm.xlu0 %342, %v13_v11   ;;  %46 = vperm.xlu1 %343, %v17_v12  }
  0x14   :  { %304 = vmatpush.msra.mxu1 %v136_v22  ;;  %306 = vmatpush.msra.mxu3 %v136_v22 }
  0x15   :  { %308 = vmatpush.msra.mxu2 %v135_v23  ;;  %148 = vmatpush.msra.mxu0 %v135_v23 }
  0x16   :  { %307 = vmatpush.msra.mxu1 %v135_v23  ;;  %309 = vmatpush.msra.mxu3 %v135_v23 }
  0x17   :  { %311 = vmatpush.msra.mxu2 %v134_v24  ;;  %149 = vmatpush.msra.mxu0 %v134_v24 }
  0x18   :  { %310 = vmatpush.msra.mxu1 %v134_v24  ;;  %312 = vmatpush.msra.mxu3 %v134_v24 }
  0x19   :  { %314 = vmatpush.msra.mxu2 %v133_v25  ;;  %150 = vmatpush.msra.mxu0 %v133_v25 }
  0x1a   :  { %49 = vperm.xlu2 %344, %v18_v13   ;;  %313 = vmatpush.msra.mxu1 %v133_v25 }
  0x1b   :  { %73 = vperm.xlu0 %342, %v26_v14   ;;  %37 = vperm.xlu1 %343, %v14_v15  }
  0x1c   :  { %315 = vmatpush.msra.mxu3 %v133_v25  ;;  %317 = vmatpush.msra.mxu2 %v132_v26 }
  0x1d   :  { %151 = vmatpush.msra.mxu0 %v132_v26  ;;  %316 = vmatpush.msra.mxu1 %v132_v26 }
  0x1e   :  { %318 = vmatpush.msra.mxu3 %v132_v26  ;;  %320 = vmatpush.msra.mxu2 %v131_v27 }
  0x1f   :  { %152 = vmatpush.msra.mxu0 %v131_v27  ;;  %319 = vmatpush.msra.mxu1 %v131_v27 }
  0x20   :  { %321 = vmatpush.msra.mxu3 %v131_v27  ;;  %323 = vmatpush.msra.mxu2 %v130_v28 }
  0x21   :  { %153 = vmatpush.msra.mxu0 %v130_v28  ;;  %322 = vmatpush.msra.mxu1 %v130_v28 }
  0x22   :  { %40 = vperm.xlu2 %344, %v15_v16   ;;  %324 = vmatpush.msra.mxu3 %v130_v28 }
  0x23   :  { %64 = vperm.xlu0 %342, %v23_v17   ;;  %76 = vperm.xlu1 %343, %v27_v18  }
  0x24   :  { %326 = vmatpush.msra.mxu2 %v129_v29  ;;  %154 = vmatpush.msra.mxu0 %v129_v29 }
  0x25   :  { %325 = vmatpush.msra.mxu1 %v129_v29  ;;  %327 = vmatpush.msra.mxu3 %v129_v29 }
  0x26   :  { %329 = vmatpush.msra.mxu2 %v128_v30  ;;  %155 = vmatpush.msra.mxu0 %v128_v30 }
  0x27   :  { %328 = vmatpush.msra.mxu1 %v128_v30  ;;  %330 = vmatpush.msra.mxu3 %v128_v30 }
  0x28   :  { %332 = vmatpush.msra.mxu2 %v127_v31  ;;  %156 = vmatpush.msra.mxu0 %v127_v31 }
  0x29   :  { %331 = vmatpush.msra.mxu1 %v127_v31  ;;  %333 = vmatpush.msra.mxu3 %v127_v31 }
  0x2a   :  { %335 = vmatpush.msra.mxu2 %v126_v32  ;;  %157 = vmatpush.msra.mxu0 %v126_v32 }
  0x2b   :  { %52 = vperm.xlu0 %342, %v19_v19   ;;  %334 = vmatpush.msra.mxu1 %v126_v32 }
  0x2c   :  { %336 = vmatpush.msra.mxu3 %v126_v32 }
  0x5c   :  { %v59_v33 = vpop.permute.xlu2 %58 }
  0x5d   :  { %vm87_vm2 = vcmp.eq.s32.totalorder %v29_v35, %v59_v33 }
  0x64   :  { %v71_v36 = vpop.permute.xlu2 %70 }
  0x65   :  { %vm91_vm7 = vcmp.eq.s32.totalorder %v29_v35, %v71_v36 }
  0x6c   :  { %v62_v42 = vpop.permute.xlu2 %61 }
  0x6d   :  { %vm88_vm8 = vcmp.eq.s32.totalorder %v29_v35, %v62_v42 }
  0x74   :  { %v50_v45 = vpop.permute.xlu2 %49 }
  0x75   :  { %v56_v37 = vpop.permute.xlu0 %55  ;;  %v32_v38 = vpop.permute.xlu1 %31  ;;  %vm84_vm9 = vcmp.eq.s32.totalorder %v29_v35, %v50_v45 }
  0x76   :  { %vm86_vm0 = vcmp.eq.s32.totalorder %v29_v35, %v56_v37  ;;  %vm78_vm1 = vcmp.eq.s32.totalorder %v29_v35, %v32_v38 }
  0x77   :  { %281 = vmatmul.msk.f32.vlgmr.msra.gmra.mxu2 %vm86_vm0, %v372_v39  ;;  %273 = vmatmul.msk.f32.vlgmr.msra.gmra.mxu0 %vm78_vm1, %v372_v39 }
  0x7c   :  { %v41_v48 = vpop.permute.xlu2 %40 }
  0x7d   :  { %v68_v40 = vpop.permute.xlu0 %67  ;;  %v44_v41 = vpop.permute.xlu1 %43  ;;  %vm81_vm12 = vcmp.eq.s32.totalorder %v29_v35, %v41_v48 }
  0x7e   :  { %vm90_vm3 = vcmp.eq.s32.totalorder %v29_v35, %v68_v40  ;;  %vm82_vm4 = vcmp.eq.s32.totalorder %v29_v35, %v44_v41 }
  0x7f   :  { %277 = vmatmul.msk.f32.vlgmr.msra.gmra.mxu1 %vm82_vm4, %v372_v39  ;;  %282 = vmatmul.msk.f32.gmra.mxu2 %vm87_vm2, %v372_v39 }
  0x80   :  { %285 = vmatmul.msk.f32.vlgmr.msra.gmra.mxu3 %vm90_vm3, %v372_v39 }
  0x85   :  { %v35_v43 = vpop.permute.xlu0 %34  ;;  %v47_v44 = vpop.permute.xlu1 %46 }
  0x86   :  { %vm79_vm5 = vcmp.eq.s32.totalorder %v29_v35, %v35_v43  ;;  %vm83_vm6 = vcmp.eq.s32.totalorder %v29_v35, %v47_v44 }
  0x87   :  { %274 = vmatmul.msk.f32.gmra.mxu0 %vm79_vm5, %v372_v39  ;;  %278 = vmatmul.msk.f32.gmra.mxu1 %vm83_vm6, %v372_v39 }
  0x88   :  { %283 = vmatmul.msk.f32.gmra.mxu2 %vm88_vm8, %v372_v39  ;;  %286 = vmatmul.msk.f32.gmra.mxu3 %vm91_vm7, %v372_v39 }
  0x8d   :  { %v74_v46 = vpop.permute.xlu0 %73  ;;  %v38_v47 = vpop.permute.xlu1 %37 }
  0x8e   :  { %vm92_vm10 = vcmp.eq.s32.totalorder %v29_v35, %v74_v46  ;;  %vm80_vm11 = vcmp.eq.s32.totalorder %v29_v35, %v38_v47 }
  0x8f   :  { %275 = vmatmul.msk.f32.gmra.mxu0 %vm80_vm11, %v372_v39  ;;  %279 = vmatmul.msk.f32.gmra.mxu1 %vm84_vm9, %v372_v39 }
  0x90   :  { %287 = vmatmul.msk.f32.gmra.mxu3 %vm92_vm10, %v372_v39 }
  0x95   :  { %v65_v49 = vpop.permute.xlu0 %64  ;;  %v77_v50 = vpop.permute.xlu1 %76 }
  0x96   :  { %vm89_vm13 = vcmp.eq.s32.totalorder %v29_v35, %v65_v49  ;;  %vm93_vm14 = vcmp.eq.s32.totalorder %v29_v35, %v77_v50 }
  0x97   :  { %276 = vmatmul.msk.f32.gmra.mxu0 %vm81_vm12, %v372_v39  ;;  %284 = vmatmul.msk.f32.gmra.mxu2 %vm89_vm13, %v372_v39 }
  0x98   :  { %288 = vmatmul.msk.f32.gmra.mxu3 %vm93_vm14, %v372_v39 }
  0x9d   :  { %v53_v51 = vpop.permute.xlu0 %52 }
  0x9e   :  { %vm85_vm15 = vcmp.eq.s32.totalorder %v29_v35, %v53_v51 }
  0x9f   :  { %280 = vmatmul.msk.f32.gmra.mxu1 %vm85_vm15, %v372_v39 }
  0xf4   :  { %v159_v52 = vpop.f32.mrf.mxu0 }
  0xf5   :  { %v207_v53 = vmul.f32 5.656854, %v159_v52 }
  0xf7   :  { %223 = vst [vmem:[#allocation2] sm:$0xff] %v207_v53 }
  0xfa   :  { %v183_v54 = vpop.f32.mrf.mxu2 }
  0xfb   :  { %v215_v55 = vmul.f32 5.656854, %v183_v54 }
  0xfc   :  { %v171_v56 = vpop.f32.mrf.mxu1 }
  0xfd   :  { %231 = vst [vmem:[#allocation2 + $0x40] sm:$0xff] %v215_v55  ;;  %v211_v57 = vmul.f32 5.656854, %v171_v56 }
  0xff   :  { %227 = vst [vmem:[#allocation2 + $0x20] sm:$0xff] %v211_v57 }
 0x102   :  { %v186_v58 = vpop.f32.mrf.mxu2 }
 0x103   :  { %v216_v59 = vmul.f32 5.656854, %v186_v58  ;;  %v195_v60 = vpop.f32.mrf.mxu3 }
 0x104   :  { %v219_v61 = vmul.f32 5.656854, %v195_v60  ;;  %v162_v62 = vpop.f32.mrf.mxu0  ;;  %v174_v63 = vpop.f32.mrf.mxu1 }
 0x105   :  { %232 = vst [vmem:[#allocation2 + $0x48] sm:$0xff] %v216_v59  ;;  %v208_v0 = vmul.f32 5.656854, %v162_v62  ;;  %v212_v1 = vmul.f32 5.656854, %v174_v63 }
 0x106   :  { %235 = vst [vmem:[#allocation2 + $0x60] sm:$0xff] %v219_v61 }
 0x107   :  { %224 = vst [vmem:[#allocation2 + $0x8] sm:$0xff] %v208_v0 }
 0x108   :  { %228 = vst [vmem:[#allocation2 + $0x28] sm:$0xff] %v212_v1 }
 0x10b   :  { %v189_v2 = vpop.f32.mrf.mxu2  ;;  %v198_v3 = vpop.f32.mrf.mxu3 }
 0x10c   :  { %v217_v4 = vmul.f32 5.656854, %v189_v2  ;;  %v220_v5 = vmul.f32 5.656854, %v198_v3  ;;  %v165_v6 = vpop.f32.mrf.mxu0  ;;  %v177_v7 = vpop.f32.mrf.mxu1 }
 0x10d   :  { %v209_v8 = vmul.f32 5.656854, %v165_v6  ;;  %v213_v9 = vmul.f32 5.656854, %v177_v7 }
 0x10e   :  { %233 = vst [vmem:[#allocation2 + $0x50] sm:$0xff] %v217_v4 }
 0x10f   :  { %236 = vst [vmem:[#allocation2 + $0x68] sm:$0xff] %v220_v5 }
 0x110   :  { %225 = vst [vmem:[#allocation2 + $0x10] sm:$0xff] %v209_v8 }
 0x111   :  { %229 = vst [vmem:[#allocation2 + $0x30] sm:$0xff] %v213_v9 }
 0x113   :  { %v201_v10 = vpop.f32.mrf.mxu3 }
 0x114   :  { %v221_v11 = vmul.f32 5.656854, %v201_v10  ;;  %v168_v12 = vpop.f32.mrf.mxu0 }
 0x115   :  { %v210_v13 = vmul.f32 5.656854, %v168_v12 }
 0x116   :  { %237 = vst [vmem:[#allocation2 + $0x70] sm:$0xff] %v221_v11 }
 0x117   :  { %226 = vst [vmem:[#allocation2 + $0x18] sm:$0xff] %v210_v13 }
 0x11a   :  { %v192_v14 = vpop.f32.mrf.mxu2 }
 0x11b   :  { %v218_v15 = vmul.f32 5.656854, %v192_v14  ;;  %v204_v16 = vpop.f32.mrf.mxu3 }
 0x11c   :  { %v222_v17 = vmul.f32 5.656854, %v204_v16  ;;  %v180_v18 = vpop.f32.mrf.mxu1 }
 0x11d   :  { %234 = vst [vmem:[#allocation2 + $0x58] sm:$0xff] %v218_v15  ;;  %v214_v19 = vmul.f32 5.656854, %v180_v18 }
 0x11e   :  { %238 = vst [vmem:[#allocation2 + $0x78] sm:$0xff] %v222_v17 }
 0x11f   :  { %230 = vst [vmem:[#allocation2 + $0x38] sm:$0xff] %v214_v19 }
 0x120   :  { %251 = dma.vmem_to_hbm [thread:$0]  %s244_s16, 2048, %s246_s19, [#allocation3], %s374_s20, %s374_s20, %s375_s21  }
 0x121   :  { %369 = dma.done.wait [#allocation3], 2048  }
 0x122   :  { %370 = vsyncadd [#allocation3], 4294965248 }
 0x123   :  { %256 = vsyncpa [#allocation3], 1 }

</bundles_post_ra>
